<compile_context>
chip_gen: v7x
topology: tpu7x:2x2x1
jax: 0.10.0
libtpu: 0.0.40
codegen_flags: <defaults>
</compile_context>

<pallas_src>
import functools

import jax
import jax.numpy as jnp
from jax import lax
from jax.experimental import pallas as pl
from jax.experimental.pallas import tpu as pltpu

# "dataset" configuration (deterministic, in-script — no file loads)
NUM_ATOM_CLASSES = 5              # QM9-like: C, N, O, F, virtual
VIRTUAL_CLASS = NUM_ATOM_CLASSES - 1
# Per-class valence caps for the non-virtual classes (C, N, O, F) are
# (4, 3, 2, 1), i.e. cap(class) = 4 - class.

_LANE_CHUNK = 512   # in-kernel lane sub-loop width (bounds vreg live ranges)


def _mol_stats_kernel(x_ref, adj_ref, valence_ref, stats_ref, *,
                      total_b, lane_chunk, atom_unroll):
    """Per-molecule valence / atom / bond / validity statistics.

    Layout: batch on the lane axis; adjacency pre-symmetrized, diag-zeroed,
    flattened to 2-D.
      x_ref:       (N,   TB) f32   node class value per atom
      adj_ref:     (N*N, TB) int8  symmetric bond orders {0..3}, zero diag
      valence_ref: (N,   TB) f32   out: per-atom valence
      stats_ref:   (8,   TB) f32   out rows: [n_atoms, n_bonds, mol_valid,
                                              lane_valid, 0, 0, 0, 0]
    """
    n_atoms, tb = x_ref.shape
    n_chunks = tb // lane_chunk
    cls_max = float(NUM_ATOM_CLASSES - 1)
    virt = float(VIRTUAL_CLASS)

    base_lane = pl.program_id(0) * tb

    # Static lane-chunk loop: keeps all slices static / lane-aligned while
    # bounding the (N, chunk) accumulator live ranges to ~2 * N*chunk/1024
    # vregs per chunk regardless of how wide the DMA block (tb) is.
    for c in range(n_chunks):
        c0 = c * lane_chunk
        cols = slice(c0, c0 + lane_chunk)

        def step(i, val_acc, bond_acc):
            # adjacency row i (already symmetric, zero diagonal)
            if isinstance(i, int):
                row_sl = slice(i * n_atoms, (i + 1) * n_atoms)
                xi_sl = slice(i, i + 1)
            else:
                row_sl = pl.ds(pl.multiple_of(i * n_atoms, n_atoms), n_atoms)
                xi_sl = pl.ds(i, 1)
            row = adj_ref[row_sl, cols].astype(jnp.float32)      # (N, chunk)
            # per-row real-atom mask for atom i (recomputed; keeps loop lean)
            xi = x_ref[xi_sl, cols]                              # (1, chunk)
            mi = (jnp.clip(jnp.round(xi), 0.0, cls_max) != virt
                  ).astype(jnp.float32)
            sym = row * mi
            return (val_acc + sym,
                    bond_acc + (sym > 0.0).astype(jnp.float32))

        zero = jnp.zeros((n_atoms, lane_chunk), jnp.float32)
        if n_atoms <= 16:
            # small molecules: full static unroll (LLO sees everything)
            val_acc, bond_acc = zero, zero
            for i in range(n_atoms):
                val_acc, bond_acc = step(i, val_acc, bond_acc)
        else:
            # larger molecules: partially-unrolled fori_loop bounds code size
            # and live ranges
            val_acc, bond_acc = lax.fori_loop(
                0, n_atoms, lambda i, carry: step(i, *carry), (zero, zero),
                unroll=atom_unroll)

        # --- post-loop: node classes / caps / stats (computed once) ---------
        x = x_ref[:, cols]                                       # (N, chunk)
        atom_idx = jnp.clip(jnp.round(x), 0.0, cls_max)
        node_mask = (atom_idx != virt).astype(jnp.float32)
        cap = 4.0 - atom_idx          # caps (4,3,2,1) for classes (0,1,2,3)

        # tail-tile batch mask: padded lanes contribute nothing host-side
        lane = lax.broadcasted_iota(jnp.int32, (1, lane_chunk), 1)
        batch_mask = ((base_lane + c0 + lane) < total_b).astype(jnp.float32)

        valence = node_mask * val_acc
        valence_ref[:, cols] = valence * batch_mask

        num_atoms = jnp.sum(node_mask, axis=0, keepdims=True)    # (1, chunk)
        num_bonds = 0.5 * jnp.sum(node_mask * bond_acc, axis=0, keepdims=True)

        # molecule is valid iff no real atom exceeds its class valence cap
        bad = node_mask * (valence > cap).astype(jnp.float32)
        num_bad = jnp.sum(bad, axis=0, keepdims=True)
        mol_valid = jnp.logical_and(num_bad == 0.0,
                                    num_atoms > 0.0).astype(jnp.float32)

        # single full-block, unmasked lane-dense store (rows 4..7 unused)
        stats = jnp.concatenate(
            [num_atoms, num_bonds, mol_valid, jnp.ones_like(num_atoms),
             jnp.zeros((4, lane_chunk), jnp.float32)], axis=0)
        stats_ref[:, cols] = stats * batch_mask


def _pick_tile_b(b, n):
    """Generation-aware batch-tile (lane) width + scoped-VMEM limit."""
    try:
        vmem_cap = int(pltpu.get_tpu_info().vmem_capacity_bytes)
    except Exception:  # pragma: no cover - conservative (v7x-sized) fallback
        vmem_cap = 64 * 1024 * 1024

    # per-step working set, bytes per batch lane:
    #   int8 adjacency block, double-buffered ............ 2 * n*n
    #   f32 x block + valence output (double-buffered) .... ~16 * n
    #   in-kernel f32 accumulators / row temporaries ...... ~16 * n
    per_lane = 2 * n * n + 32 * n + 128
    budget = min(vmem_cap // 4, 32 * 1024 * 1024)   # ~16 MiB on v7x, 32 MiB else
    tb = (budget // per_lane) // 128 * 128
    tb = max(128, min(tb, 4096))
    # don't over-pad tiny batches
    tb = min(tb, max(128, pl.cdiv(b, 128) * 128))
    # keep >= 2 grid steps when possible so ("parallel",) shards over both
    # v7x TensorCores
    if pl.cdiv(b, tb) < 2 and tb > 128:
        tb = max(128, (tb // 2) // 128 * 128)
    # in-kernel lane sub-loop expects tb % chunk == 0
    if tb > _LANE_CHUNK:
        tb = (tb // _LANE_CHUNK) * _LANE_CHUNK

    vmem_limit = int(min(vmem_cap * 3 // 4, 96 * 1024 * 1024))
    return int(tb), vmem_limit


@jax.jit
def mol_sampling_metric(x_gen, adj_gen):
    """Pallas-backed analogue of MolSamplingMetric.forward (tensor part).

    Returns (nvun, result_dict) like the PyTorch module, restricted to the
    metrics that are tensor-computable on-device.
    """
    b, n = x_gen.shape
    assert adj_gen.shape == (b, n, n)

    # --- discretize + pre-symmetrize + diag-zero (fuses under jit) ----------
    if jnp.issubdtype(adj_gen.dtype, jnp.floating):
        adj_i8 = jnp.clip(jnp.round(adj_gen), 0, 3).astype(jnp.int8)
    else:
        adj_i8 = jnp.clip(adj_gen, 0, 3).astype(jnp.int8)
    adj_i8 = jnp.maximum(adj_i8, jnp.swapaxes(adj_i8, 1, 2))          # sym
    eye = jnp.eye(n, dtype=jnp.bool_)
    adj_i8 = jnp.where(eye[None, :, :], jnp.int8(0), adj_i8)          # no diag
    x_f32 = x_gen.astype(jnp.float32)

    tb, vmem_limit = _pick_tile_b(b, n)
    bp = pl.cdiv(b, tb) * tb
    grid = (bp // tb,)
    lane_chunk = min(_LANE_CHUNK, tb)

    # lane-dense layout: batch on the lane axis, adjacency flattened to 2-D
    x_t = jnp.pad(x_f32, ((0, bp - b), (0, 0))).T                     # (N, Bp)
    adj_t = jnp.transpose(
        jnp.pad(adj_i8, ((0, bp - b), (0, 0), (0, 0))),
        (1, 2, 0)).reshape(n * n, bp)                                 # (N*N, Bp)

    kernel = functools.partial(
        _mol_stats_kernel, total_b=b, lane_chunk=lane_chunk, atom_unroll=4)

    bytes_accessed = int(adj_t.size + 4 * x_t.size + 4 * (n * bp) + 4 * (8 * bp))
    flops = int(8 * bp * n * n)

    valence_t, stats = pl.pallas_call(
        kernel,
        out_shape=(
            jax.ShapeDtypeStruct((n, bp), jnp.float32),
            jax.ShapeDtypeStruct((8, bp), jnp.float32),
        ),
        grid=grid,
        in_specs=[
            pl.BlockSpec((n, tb), lambda i: (0, i)),
            # one contiguous rectangular int8 DMA per grid step
            pl.BlockSpec((n * n, tb), lambda i: (0, i)),
        ],
        out_specs=(
            pl.BlockSpec((n, tb), lambda i: (0, i)),
            pl.BlockSpec((8, tb), lambda i: (0, i)),
        ),
        compiler_params=pltpu.CompilerParams(
            dimension_semantics=("parallel",),
            vmem_limit_bytes=vmem_limit,
        ),
        cost_estimate=pl.CostEstimate(
            flops=flops, transcendentals=0, bytes_accessed=bytes_accessed),
    )(x_t, adj_t)

    valence = valence_t[:, :b].T                 # (B, N)
    num_atoms = stats[0, :b]
    num_bonds = stats[1, :b]
    mol_valid = stats[2, :b]

    num_mols = float(b)
    valid_wo_correct = jnp.sum(mol_valid) / num_mols

    # TODO(synk): unique@k / FCD / Novelty / NSPDK MMD need RDKit & MOSES on
    # the host (no Pallas equivalent); uniqueness proxy is 1.0 here.
    uniqueness = jnp.float32(1.0)
    nvun = valid_wo_correct * uniqueness

    result = {
        "valid_wo_correct": valid_wo_correct,
        "num_mols": num_mols,
        "num_atoms_per_mol": num_atoms,
        "num_bonds_per_mol": num_bonds,
        "mol_valid": mol_valid,
        "valence": valence,
    }
    return nvun, result


if __name__ == "__main__":
    key = jax.random.PRNGKey(0)
    k1, k2 = jax.random.split(key)

    B, N = 2, 16
    # node class indices in [0, NUM_ATOM_CLASSES-1] (last class = virtual)
    x_gen = jax.random.randint(k1, (B, N), 0, NUM_ATOM_CLASSES).astype(jnp.float32)
    # bond orders in {0, 1, 2, 3}, stored narrow (int8) in HBM
    adj_gen = jax.random.randint(k2, (B, N, N), 0, 4).astype(jnp.int8)

    nvun, result = mol_sampling_metric(x_gen, adj_gen)
    jax.block_until_ready(nvun)
    jax.block_until_ready(result["valence"])

    print("KERNEL_OK")
</pallas_src>

<mosaic_0001>
module attributes {stable_mosaic.version = 11 : i64} {
  func.func @_mol_stats_kernel(%arg0: i32, %arg1: memref<16x128xf32, #tpu.memory_space<vmem>>, %arg2: memref<256x128xi8, #tpu.memory_space<vmem>>, %arg3: memref<16x128xf32, #tpu.memory_space<vmem>>, %arg4: memref<8x128xf32, #tpu.memory_space<vmem>>) attributes {dimension_semantics = [#tpu.dimension_semantics<parallel>], iteration_bounds = array<i64: 1>, scalar_prefetch = 0 : i64, scratch_operands = 0 : i64, tpu.core_type = #tpu.core_type<tc>, window_params = [{transform_indices = @transform_0, window_bounds = array<i64: 16, 128>}, {transform_indices = @transform_1, window_bounds = array<i64: 256, 128>}, {transform_indices = @transform_2, window_bounds = array<i64: 16, 128>}, {transform_indices = @transform_3, window_bounds = array<i64: 8, 128>}]} {
    %c128_i32 = arith.constant 128 : i32
    %0 = arith.muli %arg0, %c128_i32 : i32
    %cst = arith.constant 0.000000e+00 : f32
    %1 = vector.broadcast %cst : f32 to vector<16x128xf32>
    %c0 = arith.constant 0 : index
    %c0_0 = arith.constant 0 : index
    %2 = vector.load %arg2[%c0, %c0_0] : memref<256x128xi8, #tpu.memory_space<vmem>>, vector<16x128xi8>
    %3 = arith.sitofp %2 : vector<16x128xi8> to vector<16x128xf32>
    %c0_1 = arith.constant 0 : index
    %c0_2 = arith.constant 0 : index
    %4 = vector.load %arg1[%c0_1, %c0_2] : memref<16x128xf32, #tpu.memory_space<vmem>>, vector<1x128xf32>
    %5 = math.roundeven %4 : vector<1x128xf32>
    %cst_3 = arith.constant 0.000000e+00 : f32
    %cst_4 = arith.constant 4.000000e+00 : f32
    %6 = vector.broadcast %cst_3 : f32 to vector<1x128xf32>
    %7 = arith.maximumf %6, %5 : vector<1x128xf32>
    %8 = vector.broadcast %cst_4 : f32 to vector<1x128xf32>
    %9 = arith.minimumf %8, %7 : vector<1x128xf32>
    %cst_5 = arith.constant 4.000000e+00 : f32
    %10 = vector.broadcast %cst_5 : f32 to vector<1x128xf32>
    %11 = arith.cmpf one, %9, %10 : vector<1x128xf32>
    %12 = arith.extui %11 : vector<1x128xi1> to vector<1x128xi32>
    %13 = arith.sitofp %12 : vector<1x128xi32> to vector<1x128xf32>
    %14 = vector.broadcast %13 : vector<1x128xf32> to vector<16x128xf32>
    %15 = arith.mulf %3, %14 : vector<16x128xf32>
    %16 = arith.addf %1, %15 : vector<16x128xf32>
    %cst_6 = arith.constant 0.000000e+00 : f32
    %17 = vector.broadcast %cst_6 : f32 to vector<16x128xf32>
    %18 = arith.cmpf ogt, %15, %17 : vector<16x128xf32>
    %19 = arith.extui %18 : vector<16x128xi1> to vector<16x128xi32>
    %20 = arith.sitofp %19 : vector<16x128xi32> to vector<16x128xf32>
    %21 = arith.addf %1, %20 : vector<16x128xf32>
    %c16 = arith.constant 16 : index
    %c0_7 = arith.constant 0 : index
    %22 = vector.load %arg2[%c16, %c0_7] : memref<256x128xi8, #tpu.memory_space<vmem>>, vector<16x128xi8>
    %23 = arith.sitofp %22 : vector<16x128xi8> to vector<16x128xf32>
    %c1 = arith.constant 1 : index
    %c0_8 = arith.constant 0 : index
    %24 = vector.load %arg1[%c1, %c0_8] : memref<16x128xf32, #tpu.memory_space<vmem>>, vector<1x128xf32>
    %25 = math.roundeven %24 : vector<1x128xf32>
    %cst_9 = arith.constant 0.000000e+00 : f32
    %cst_10 = arith.constant 4.000000e+00 : f32
    %26 = vector.broadcast %cst_9 : f32 to vector<1x128xf32>
    %27 = arith.maximumf %26, %25 : vector<1x128xf32>
    %28 = vector.broadcast %cst_10 : f32 to vector<1x128xf32>
    %29 = arith.minimumf %28, %27 : vector<1x128xf32>
    %cst_11 = arith.constant 4.000000e+00 : f32
    %30 = vector.broadcast %cst_11 : f32 to vector<1x128xf32>
    %31 = arith.cmpf one, %29, %30 : vector<1x128xf32>
    %32 = arith.extui %31 : vector<1x128xi1> to vector<1x128xi32>
    %33 = arith.sitofp %32 : vector<1x128xi32> to vector<1x128xf32>
    %34 = vector.broadcast %33 : vector<1x128xf32> to vector<16x128xf32>
    %35 = arith.mulf %23, %34 : vector<16x128xf32>
    %36 = arith.addf %16, %35 : vector<16x128xf32>
    %cst_12 = arith.constant 0.000000e+00 : f32
    %37 = vector.broadcast %cst_12 : f32 to vector<16x128xf32>
    %38 = arith.cmpf ogt, %35, %37 : vector<16x128xf32>
    %39 = arith.extui %38 : vector<16x128xi1> to vector<16x128xi32>
    %40 = arith.sitofp %39 : vector<16x128xi32> to vector<16x128xf32>
    %41 = arith.addf %21, %40 : vector<16x128xf32>
    %c32 = arith.constant 32 : index
    %c0_13 = arith.constant 0 : index
    %42 = vector.load %arg2[%c32, %c0_13] : memref<256x128xi8, #tpu.memory_space<vmem>>, vector<16x128xi8>
    %43 = arith.sitofp %42 : vector<16x128xi8> to vector<16x128xf32>
    %c2 = arith.constant 2 : index
    %c0_14 = arith.constant 0 : index
    %44 = vector.load %arg1[%c2, %c0_14] : memref<16x128xf32, #tpu.memory_space<vmem>>, vector<1x128xf32>
    %45 = math.roundeven %44 : vector<1x128xf32>
    %cst_15 = arith.constant 0.000000e+00 : f32
    %cst_16 = arith.constant 4.000000e+00 : f32
    %46 = vector.broadcast %cst_15 : f32 to vector<1x128xf32>
    %47 = arith.maximumf %46, %45 : vector<1x128xf32>
    %48 = vector.broadcast %cst_16 : f32 to vector<1x128xf32>
    %49 = arith.minimumf %48, %47 : vector<1x128xf32>
    %cst_17 = arith.constant 4.000000e+00 : f32
    %50 = vector.broadcast %cst_17 : f32 to vector<1x128xf32>
    %51 = arith.cmpf one, %49, %50 : vector<1x128xf32>
    %52 = arith.extui %51 : vector<1x128xi1> to vector<1x128xi32>
    %53 = arith.sitofp %52 : vector<1x128xi32> to vector<1x128xf32>
    %54 = vector.broadcast %53 : vector<1x128xf32> to vector<16x128xf32>
    %55 = arith.mulf %43, %54 : vector<16x128xf32>
    %56 = arith.addf %36, %55 : vector<16x128xf32>
    %cst_18 = arith.constant 0.000000e+00 : f32
    %57 = vector.broadcast %cst_18 : f32 to vector<16x128xf32>
    %58 = arith.cmpf ogt, %55, %57 : vector<16x128xf32>
    %59 = arith.extui %58 : vector<16x128xi1> to vector<16x128xi32>
    %60 = arith.sitofp %59 : vector<16x128xi32> to vector<16x128xf32>
    %61 = arith.addf %41, %60 : vector<16x128xf32>
    %c48 = arith.constant 48 : index
    %c0_19 = arith.constant 0 : index
    %62 = vector.load %arg2[%c48, %c0_19] : memref<256x128xi8, #tpu.memory_space<vmem>>, vector<16x128xi8>
    %63 = arith.sitofp %62 : vector<16x128xi8> to vector<16x128xf32>
    %c3 = arith.constant 3 : index
    %c0_20 = arith.constant 0 : index
    %64 = vector.load %arg1[%c3, %c0_20] : memref<16x128xf32, #tpu.memory_space<vmem>>, vector<1x128xf32>
    %65 = math.roundeven %64 : vector<1x128xf32>
    %cst_21 = arith.constant 0.000000e+00 : f32
    %cst_22 = arith.constant 4.000000e+00 : f32
    %66 = vector.broadcast %cst_21 : f32 to vector<1x128xf32>
    %67 = arith.maximumf %66, %65 : vector<1x128xf32>
    %68 = vector.broadcast %cst_22 : f32 to vector<1x128xf32>
    %69 = arith.minimumf %68, %67 : vector<1x128xf32>
    %cst_23 = arith.constant 4.000000e+00 : f32
    %70 = vector.broadcast %cst_23 : f32 to vector<1x128xf32>
    %71 = arith.cmpf one, %69, %70 : vector<1x128xf32>
    %72 = arith.extui %71 : vector<1x128xi1> to vector<1x128xi32>
    %73 = arith.sitofp %72 : vector<1x128xi32> to vector<1x128xf32>
    %74 = vector.broadcast %73 : vector<1x128xf32> to vector<16x128xf32>
    %75 = arith.mulf %63, %74 : vector<16x128xf32>
    %76 = arith.addf %56, %75 : vector<16x128xf32>
    %cst_24 = arith.constant 0.000000e+00 : f32
    %77 = vector.broadcast %cst_24 : f32 to vector<16x128xf32>
    %78 = arith.cmpf ogt, %75, %77 : vector<16x128xf32>
    %79 = arith.extui %78 : vector<16x128xi1> to vector<16x128xi32>
    %80 = arith.sitofp %79 : vector<16x128xi32> to vector<16x128xf32>
    %81 = arith.addf %61, %80 : vector<16x128xf32>
    %c64 = arith.constant 64 : index
    %c0_25 = arith.constant 0 : index
    %82 = vector.load %arg2[%c64, %c0_25] : memref<256x128xi8, #tpu.memory_space<vmem>>, vector<16x128xi8>
    %83 = arith.sitofp %82 : vector<16x128xi8> to vector<16x128xf32>
    %c4 = arith.constant 4 : index
    %c0_26 = arith.constant 0 : index
    %84 = vector.load %arg1[%c4, %c0_26] : memref<16x128xf32, #tpu.memory_space<vmem>>, vector<1x128xf32>
    %85 = math.roundeven %84 : vector<1x128xf32>
    %cst_27 = arith.constant 0.000000e+00 : f32
    %cst_28 = arith.constant 4.000000e+00 : f32
    %86 = vector.broadcast %cst_27 : f32 to vector<1x128xf32>
    %87 = arith.maximumf %86, %85 : vector<1x128xf32>
    %88 = vector.broadcast %cst_28 : f32 to vector<1x128xf32>
    %89 = arith.minimumf %88, %87 : vector<1x128xf32>
    %cst_29 = arith.constant 4.000000e+00 : f32
    %90 = vector.broadcast %cst_29 : f32 to vector<1x128xf32>
    %91 = arith.cmpf one, %89, %90 : vector<1x128xf32>
    %92 = arith.extui %91 : vector<1x128xi1> to vector<1x128xi32>
    %93 = arith.sitofp %92 : vector<1x128xi32> to vector<1x128xf32>
    %94 = vector.broadcast %93 : vector<1x128xf32> to vector<16x128xf32>
    %95 = arith.mulf %83, %94 : vector<16x128xf32>
    %96 = arith.addf %76, %95 : vector<16x128xf32>
    %cst_30 = arith.constant 0.000000e+00 : f32
    %97 = vector.broadcast %cst_30 : f32 to vector<16x128xf32>
    %98 = arith.cmpf ogt, %95, %97 : vector<16x128xf32>
    %99 = arith.extui %98 : vector<16x128xi1> to vector<16x128xi32>
    %100 = arith.sitofp %99 : vector<16x128xi32> to vector<16x128xf32>
    %101 = arith.addf %81, %100 : vector<16x128xf32>
    %c80 = arith.constant 80 : index
    %c0_31 = arith.constant 0 : index
    %102 = vector.load %arg2[%c80, %c0_31] : memref<256x128xi8, #tpu.memory_space<vmem>>, vector<16x128xi8>
    %103 = arith.sitofp %102 : vector<16x128xi8> to vector<16x128xf32>
    %c5 = arith.constant 5 : index
    %c0_32 = arith.constant 0 : index
    %104 = vector.load %arg1[%c5, %c0_32] : memref<16x128xf32, #tpu.memory_space<vmem>>, vector<1x128xf32>
    %105 = math.roundeven %104 : vector<1x128xf32>
    %cst_33 = arith.constant 0.000000e+00 : f32
    %cst_34 = arith.constant 4.000000e+00 : f32
    %106 = vector.broadcast %cst_33 : f32 to vector<1x128xf32>
    %107 = arith.maximumf %106, %105 : vector<1x128xf32>
    %108 = vector.broadcast %cst_34 : f32 to vector<1x128xf32>
    %109 = arith.minimumf %108, %107 : vector<1x128xf32>
    %cst_35 = arith.constant 4.000000e+00 : f32
    %110 = vector.broadcast %cst_35 : f32 to vector<1x128xf32>
    %111 = arith.cmpf one, %109, %110 : vector<1x128xf32>
    %112 = arith.extui %111 : vector<1x128xi1> to vector<1x128xi32>
    %113 = arith.sitofp %112 : vector<1x128xi32> to vector<1x128xf32>
    %114 = vector.broadcast %113 : vector<1x128xf32> to vector<16x128xf32>
    %115 = arith.mulf %103, %114 : vector<16x128xf32>
    %116 = arith.addf %96, %115 : vector<16x128xf32>
    %cst_36 = arith.constant 0.000000e+00 : f32
    %117 = vector.broadcast %cst_36 : f32 to vector<16x128xf32>
    %118 = arith.cmpf ogt, %115, %117 : vector<16x128xf32>
    %119 = arith.extui %118 : vector<16x128xi1> to vector<16x128xi32>
    %120 = arith.sitofp %119 : vector<16x128xi32> to vector<16x128xf32>
    %121 = arith.addf %101, %120 : vector<16x128xf32>
    %c96 = arith.constant 96 : index
    %c0_37 = arith.constant 0 : index
    %122 = vector.load %arg2[%c96, %c0_37] : memref<256x128xi8, #tpu.memory_space<vmem>>, vector<16x128xi8>
    %123 = arith.sitofp %122 : vector<16x128xi8> to vector<16x128xf32>
    %c6 = arith.constant 6 : index
    %c0_38 = arith.constant 0 : index
    %124 = vector.load %arg1[%c6, %c0_38] : memref<16x128xf32, #tpu.memory_space<vmem>>, vector<1x128xf32>
    %125 = math.roundeven %124 : vector<1x128xf32>
    %cst_39 = arith.constant 0.000000e+00 : f32
    %cst_40 = arith.constant 4.000000e+00 : f32
    %126 = vector.broadcast %cst_39 : f32 to vector<1x128xf32>
    %127 = arith.maximumf %126, %125 : vector<1x128xf32>
    %128 = vector.broadcast %cst_40 : f32 to vector<1x128xf32>
    %129 = arith.minimumf %128, %127 : vector<1x128xf32>
    %cst_41 = arith.constant 4.000000e+00 : f32
    %130 = vector.broadcast %cst_41 : f32 to vector<1x128xf32>
    %131 = arith.cmpf one, %129, %130 : vector<1x128xf32>
    %132 = arith.extui %131 : vector<1x128xi1> to vector<1x128xi32>
    %133 = arith.sitofp %132 : vector<1x128xi32> to vector<1x128xf32>
    %134 = vector.broadcast %133 : vector<1x128xf32> to vector<16x128xf32>
    %135 = arith.mulf %123, %134 : vector<16x128xf32>
    %136 = arith.addf %116, %135 : vector<16x128xf32>
    %cst_42 = arith.constant 0.000000e+00 : f32
    %137 = vector.broadcast %cst_42 : f32 to vector<16x128xf32>
    %138 = arith.cmpf ogt, %135, %137 : vector<16x128xf32>
    %139 = arith.extui %138 : vector<16x128xi1> to vector<16x128xi32>
    %140 = arith.sitofp %139 : vector<16x128xi32> to vector<16x128xf32>
    %141 = arith.addf %121, %140 : vector<16x128xf32>
    %c112 = arith.constant 112 : index
    %c0_43 = arith.constant 0 : index
    %142 = vector.load %arg2[%c112, %c0_43] : memref<256x128xi8, #tpu.memory_space<vmem>>, vector<16x128xi8>
    %143 = arith.sitofp %142 : vector<16x128xi8> to vector<16x128xf32>
    %c7 = arith.constant 7 : index
    %c0_44 = arith.constant 0 : index
    %144 = vector.load %arg1[%c7, %c0_44] : memref<16x128xf32, #tpu.memory_space<vmem>>, vector<1x128xf32>
    %145 = math.roundeven %144 : vector<1x128xf32>
    %cst_45 = arith.constant 0.000000e+00 : f32
    %cst_46 = arith.constant 4.000000e+00 : f32
    %146 = vector.broadcast %cst_45 : f32 to vector<1x128xf32>
    %147 = arith.maximumf %146, %145 : vector<1x128xf32>
    %148 = vector.broadcast %cst_46 : f32 to vector<1x128xf32>
    %149 = arith.minimumf %148, %147 : vector<1x128xf32>
    %cst_47 = arith.constant 4.000000e+00 : f32
    %150 = vector.broadcast %cst_47 : f32 to vector<1x128xf32>
    %151 = arith.cmpf one, %149, %150 : vector<1x128xf32>
    %152 = arith.extui %151 : vector<1x128xi1> to vector<1x128xi32>
    %153 = arith.sitofp %152 : vector<1x128xi32> to vector<1x128xf32>
    %154 = vector.broadcast %153 : vector<1x128xf32> to vector<16x128xf32>
    %155 = arith.mulf %143, %154 : vector<16x128xf32>
    %156 = arith.addf %136, %155 : vector<16x128xf32>
    %cst_48 = arith.constant 0.000000e+00 : f32
    %157 = vector.broadcast %cst_48 : f32 to vector<16x128xf32>
    %158 = arith.cmpf ogt, %155, %157 : vector<16x128xf32>
    %159 = arith.extui %158 : vector<16x128xi1> to vector<16x128xi32>
    %160 = arith.sitofp %159 : vector<16x128xi32> to vector<16x128xf32>
    %161 = arith.addf %141, %160 : vector<16x128xf32>
    %c128 = arith.constant 128 : index
    %c0_49 = arith.constant 0 : index
    %162 = vector.load %arg2[%c128, %c0_49] : memref<256x128xi8, #tpu.memory_space<vmem>>, vector<16x128xi8>
    %163 = arith.sitofp %162 : vector<16x128xi8> to vector<16x128xf32>
    %c8 = arith.constant 8 : index
    %c0_50 = arith.constant 0 : index
    %164 = vector.load %arg1[%c8, %c0_50] : memref<16x128xf32, #tpu.memory_space<vmem>>, vector<1x128xf32>
    %165 = math.roundeven %164 : vector<1x128xf32>
    %cst_51 = arith.constant 0.000000e+00 : f32
    %cst_52 = arith.constant 4.000000e+00 : f32
    %166 = vector.broadcast %cst_51 : f32 to vector<1x128xf32>
    %167 = arith.maximumf %166, %165 : vector<1x128xf32>
    %168 = vector.broadcast %cst_52 : f32 to vector<1x128xf32>
    %169 = arith.minimumf %168, %167 : vector<1x128xf32>
    %cst_53 = arith.constant 4.000000e+00 : f32
    %170 = vector.broadcast %cst_53 : f32 to vector<1x128xf32>
    %171 = arith.cmpf one, %169, %170 : vector<1x128xf32>
    %172 = arith.extui %171 : vector<1x128xi1> to vector<1x128xi32>
    %173 = arith.sitofp %172 : vector<1x128xi32> to vector<1x128xf32>
    %174 = vector.broadcast %173 : vector<1x128xf32> to vector<16x128xf32>
    %175 = arith.mulf %163, %174 : vector<16x128xf32>
    %176 = arith.addf %156, %175 : vector<16x128xf32>
    %cst_54 = arith.constant 0.000000e+00 : f32
    %177 = vector.broadcast %cst_54 : f32 to vector<16x128xf32>
    %178 = arith.cmpf ogt, %175, %177 : vector<16x128xf32>
    %179 = arith.extui %178 : vector<16x128xi1> to vector<16x128xi32>
    %180 = arith.sitofp %179 : vector<16x128xi32> to vector<16x128xf32>
    %181 = arith.addf %161, %180 : vector<16x128xf32>
    %c144 = arith.constant 144 : index
    %c0_55 = arith.constant 0 : index
    %182 = vector.load %arg2[%c144, %c0_55] : memref<256x128xi8, #tpu.memory_space<vmem>>, vector<16x128xi8>
    %183 = arith.sitofp %182 : vector<16x128xi8> to vector<16x128xf32>
    %c9 = arith.constant 9 : index
    %c0_56 = arith.constant 0 : index
    %184 = vector.load %arg1[%c9, %c0_56] : memref<16x128xf32, #tpu.memory_space<vmem>>, vector<1x128xf32>
    %185 = math.roundeven %184 : vector<1x128xf32>
    %cst_57 = arith.constant 0.000000e+00 : f32
    %cst_58 = arith.constant 4.000000e+00 : f32
    %186 = vector.broadcast %cst_57 : f32 to vector<1x128xf32>
    %187 = arith.maximumf %186, %185 : vector<1x128xf32>
    %188 = vector.broadcast %cst_58 : f32 to vector<1x128xf32>
    %189 = arith.minimumf %188, %187 : vector<1x128xf32>
    %cst_59 = arith.constant 4.000000e+00 : f32
    %190 = vector.broadcast %cst_59 : f32 to vector<1x128xf32>
    %191 = arith.cmpf one, %189, %190 : vector<1x128xf32>
    %192 = arith.extui %191 : vector<1x128xi1> to vector<1x128xi32>
    %193 = arith.sitofp %192 : vector<1x128xi32> to vector<1x128xf32>
    %194 = vector.broadcast %193 : vector<1x128xf32> to vector<16x128xf32>
    %195 = arith.mulf %183, %194 : vector<16x128xf32>
    %196 = arith.addf %176, %195 : vector<16x128xf32>
    %cst_60 = arith.constant 0.000000e+00 : f32
    %197 = vector.broadcast %cst_60 : f32 to vector<16x128xf32>
    %198 = arith.cmpf ogt, %195, %197 : vector<16x128xf32>
    %199 = arith.extui %198 : vector<16x128xi1> to vector<16x128xi32>
    %200 = arith.sitofp %199 : vector<16x128xi32> to vector<16x128xf32>
    %201 = arith.addf %181, %200 : vector<16x128xf32>
    %c160 = arith.constant 160 : index
    %c0_61 = arith.constant 0 : index
    %202 = vector.load %arg2[%c160, %c0_61] : memref<256x128xi8, #tpu.memory_space<vmem>>, vector<16x128xi8>
    %203 = arith.sitofp %202 : vector<16x128xi8> to vector<16x128xf32>
    %c10 = arith.constant 10 : index
    %c0_62 = arith.constant 0 : index
    %204 = vector.load %arg1[%c10, %c0_62] : memref<16x128xf32, #tpu.memory_space<vmem>>, vector<1x128xf32>
    %205 = math.roundeven %204 : vector<1x128xf32>
    %cst_63 = arith.constant 0.000000e+00 : f32
    %cst_64 = arith.constant 4.000000e+00 : f32
    %206 = vector.broadcast %cst_63 : f32 to vector<1x128xf32>
    %207 = arith.maximumf %206, %205 : vector<1x128xf32>
    %208 = vector.broadcast %cst_64 : f32 to vector<1x128xf32>
    %209 = arith.minimumf %208, %207 : vector<1x128xf32>
    %cst_65 = arith.constant 4.000000e+00 : f32
    %210 = vector.broadcast %cst_65 : f32 to vector<1x128xf32>
    %211 = arith.cmpf one, %209, %210 : vector<1x128xf32>
    %212 = arith.extui %211 : vector<1x128xi1> to vector<1x128xi32>
    %213 = arith.sitofp %212 : vector<1x128xi32> to vector<1x128xf32>
    %214 = vector.broadcast %213 : vector<1x128xf32> to vector<16x128xf32>
    %215 = arith.mulf %203, %214 : vector<16x128xf32>
    %216 = arith.addf %196, %215 : vector<16x128xf32>
    %cst_66 = arith.constant 0.000000e+00 : f32
    %217 = vector.broadcast %cst_66 : f32 to vector<16x128xf32>
    %218 = arith.cmpf ogt, %215, %217 : vector<16x128xf32>
    %219 = arith.extui %218 : vector<16x128xi1> to vector<16x128xi32>
    %220 = arith.sitofp %219 : vector<16x128xi32> to vector<16x128xf32>
    %221 = arith.addf %201, %220 : vector<16x128xf32>
    %c176 = arith.constant 176 : index
    %c0_67 = arith.constant 0 : index
    %222 = vector.load %arg2[%c176, %c0_67] : memref<256x128xi8, #tpu.memory_space<vmem>>, vector<16x128xi8>
    %223 = arith.sitofp %222 : vector<16x128xi8> to vector<16x128xf32>
    %c11 = arith.constant 11 : index
    %c0_68 = arith.constant 0 : index
    %224 = vector.load %arg1[%c11, %c0_68] : memref<16x128xf32, #tpu.memory_space<vmem>>, vector<1x128xf32>
    %225 = math.roundeven %224 : vector<1x128xf32>
    %cst_69 = arith.constant 0.000000e+00 : f32
    %cst_70 = arith.constant 4.000000e+00 : f32
    %226 = vector.broadcast %cst_69 : f32 to vector<1x128xf32>
    %227 = arith.maximumf %226, %225 : vector<1x128xf32>
    %228 = vector.broadcast %cst_70 : f32 to vector<1x128xf32>
    %229 = arith.minimumf %228, %227 : vector<1x128xf32>
    %cst_71 = arith.constant 4.000000e+00 : f32
    %230 = vector.broadcast %cst_71 : f32 to vector<1x128xf32>
    %231 = arith.cmpf one, %229, %230 : vector<1x128xf32>
    %232 = arith.extui %231 : vector<1x128xi1> to vector<1x128xi32>
    %233 = arith.sitofp %232 : vector<1x128xi32> to vector<1x128xf32>
    %234 = vector.broadcast %233 : vector<1x128xf32> to vector<16x128xf32>
    %235 = arith.mulf %223, %234 : vector<16x128xf32>
    %236 = arith.addf %216, %235 : vector<16x128xf32>
    %cst_72 = arith.constant 0.000000e+00 : f32
    %237 = vector.broadcast %cst_72 : f32 to vector<16x128xf32>
    %238 = arith.cmpf ogt, %235, %237 : vector<16x128xf32>
    %239 = arith.extui %238 : vector<16x128xi1> to vector<16x128xi32>
    %240 = arith.sitofp %239 : vector<16x128xi32> to vector<16x128xf32>
    %241 = arith.addf %221, %240 : vector<16x128xf32>
    %c192 = arith.constant 192 : index
    %c0_73 = arith.constant 0 : index
    %242 = vector.load %arg2[%c192, %c0_73] : memref<256x128xi8, #tpu.memory_space<vmem>>, vector<16x128xi8>
    %243 = arith.sitofp %242 : vector<16x128xi8> to vector<16x128xf32>
    %c12 = arith.constant 12 : index
    %c0_74 = arith.constant 0 : index
    %244 = vector.load %arg1[%c12, %c0_74] : memref<16x128xf32, #tpu.memory_space<vmem>>, vector<1x128xf32>
    %245 = math.roundeven %244 : vector<1x128xf32>
    %cst_75 = arith.constant 0.000000e+00 : f32
    %cst_76 = arith.constant 4.000000e+00 : f32
    %246 = vector.broadcast %cst_75 : f32 to vector<1x128xf32>
    %247 = arith.maximumf %246, %245 : vector<1x128xf32>
    %248 = vector.broadcast %cst_76 : f32 to vector<1x128xf32>
    %249 = arith.minimumf %248, %247 : vector<1x128xf32>
    %cst_77 = arith.constant 4.000000e+00 : f32
    %250 = vector.broadcast %cst_77 : f32 to vector<1x128xf32>
    %251 = arith.cmpf one, %249, %250 : vector<1x128xf32>
    %252 = arith.extui %251 : vector<1x128xi1> to vector<1x128xi32>
    %253 = arith.sitofp %252 : vector<1x128xi32> to vector<1x128xf32>
    %254 = vector.broadcast %253 : vector<1x128xf32> to vector<16x128xf32>
    %255 = arith.mulf %243, %254 : vector<16x128xf32>
    %256 = arith.addf %236, %255 : vector<16x128xf32>
    %cst_78 = arith.constant 0.000000e+00 : f32
    %257 = vector.broadcast %cst_78 : f32 to vector<16x128xf32>
    %258 = arith.cmpf ogt, %255, %257 : vector<16x128xf32>
    %259 = arith.extui %258 : vector<16x128xi1> to vector<16x128xi32>
    %260 = arith.sitofp %259 : vector<16x128xi32> to vector<16x128xf32>
    %261 = arith.addf %241, %260 : vector<16x128xf32>
    %c208 = arith.constant 208 : index
    %c0_79 = arith.constant 0 : index
    %262 = vector.load %arg2[%c208, %c0_79] : memref<256x128xi8, #tpu.memory_space<vmem>>, vector<16x128xi8>
    %263 = arith.sitofp %262 : vector<16x128xi8> to vector<16x128xf32>
    %c13 = arith.constant 13 : index
    %c0_80 = arith.constant 0 : index
    %264 = vector.load %arg1[%c13, %c0_80] : memref<16x128xf32, #tpu.memory_space<vmem>>, vector<1x128xf32>
    %265 = math.roundeven %264 : vector<1x128xf32>
    %cst_81 = arith.constant 0.000000e+00 : f32
    %cst_82 = arith.constant 4.000000e+00 : f32
    %266 = vector.broadcast %cst_81 : f32 to vector<1x128xf32>
    %267 = arith.maximumf %266, %265 : vector<1x128xf32>
    %268 = vector.broadcast %cst_82 : f32 to vector<1x128xf32>
    %269 = arith.minimumf %268, %267 : vector<1x128xf32>
    %cst_83 = arith.constant 4.000000e+00 : f32
    %270 = vector.broadcast %cst_83 : f32 to vector<1x128xf32>
    %271 = arith.cmpf one, %269, %270 : vector<1x128xf32>
    %272 = arith.extui %271 : vector<1x128xi1> to vector<1x128xi32>
    %273 = arith.sitofp %272 : vector<1x128xi32> to vector<1x128xf32>
    %274 = vector.broadcast %273 : vector<1x128xf32> to vector<16x128xf32>
    %275 = arith.mulf %263, %274 : vector<16x128xf32>
    %276 = arith.addf %256, %275 : vector<16x128xf32>
    %cst_84 = arith.constant 0.000000e+00 : f32
    %277 = vector.broadcast %cst_84 : f32 to vector<16x128xf32>
    %278 = arith.cmpf ogt, %275, %277 : vector<16x128xf32>
    %279 = arith.extui %278 : vector<16x128xi1> to vector<16x128xi32>
    %280 = arith.sitofp %279 : vector<16x128xi32> to vector<16x128xf32>
    %281 = arith.addf %261, %280 : vector<16x128xf32>
    %c224 = arith.constant 224 : index
    %c0_85 = arith.constant 0 : index
    %282 = vector.load %arg2[%c224, %c0_85] : memref<256x128xi8, #tpu.memory_space<vmem>>, vector<16x128xi8>
    %283 = arith.sitofp %282 : vector<16x128xi8> to vector<16x128xf32>
    %c14 = arith.constant 14 : index
    %c0_86 = arith.constant 0 : index
    %284 = vector.load %arg1[%c14, %c0_86] : memref<16x128xf32, #tpu.memory_space<vmem>>, vector<1x128xf32>
    %285 = math.roundeven %284 : vector<1x128xf32>
    %cst_87 = arith.constant 0.000000e+00 : f32
    %cst_88 = arith.constant 4.000000e+00 : f32
    %286 = vector.broadcast %cst_87 : f32 to vector<1x128xf32>
    %287 = arith.maximumf %286, %285 : vector<1x128xf32>
    %288 = vector.broadcast %cst_88 : f32 to vector<1x128xf32>
    %289 = arith.minimumf %288, %287 : vector<1x128xf32>
    %cst_89 = arith.constant 4.000000e+00 : f32
    %290 = vector.broadcast %cst_89 : f32 to vector<1x128xf32>
    %291 = arith.cmpf one, %289, %290 : vector<1x128xf32>
    %292 = arith.extui %291 : vector<1x128xi1> to vector<1x128xi32>
    %293 = arith.sitofp %292 : vector<1x128xi32> to vector<1x128xf32>
    %294 = vector.broadcast %293 : vector<1x128xf32> to vector<16x128xf32>
    %295 = arith.mulf %283, %294 : vector<16x128xf32>
    %296 = arith.addf %276, %295 : vector<16x128xf32>
    %cst_90 = arith.constant 0.000000e+00 : f32
    %297 = vector.broadcast %cst_90 : f32 to vector<16x128xf32>
    %298 = arith.cmpf ogt, %295, %297 : vector<16x128xf32>
    %299 = arith.extui %298 : vector<16x128xi1> to vector<16x128xi32>
    %300 = arith.sitofp %299 : vector<16x128xi32> to vector<16x128xf32>
    %301 = arith.addf %281, %300 : vector<16x128xf32>
    %c240 = arith.constant 240 : index
    %c0_91 = arith.constant 0 : index
    %302 = vector.load %arg2[%c240, %c0_91] : memref<256x128xi8, #tpu.memory_space<vmem>>, vector<16x128xi8>
    %303 = arith.sitofp %302 : vector<16x128xi8> to vector<16x128xf32>
    %c15 = arith.constant 15 : index
    %c0_92 = arith.constant 0 : index
    %304 = vector.load %arg1[%c15, %c0_92] : memref<16x128xf32, #tpu.memory_space<vmem>>, vector<1x128xf32>
    %305 = math.roundeven %304 : vector<1x128xf32>
    %cst_93 = arith.constant 0.000000e+00 : f32
    %cst_94 = arith.constant 4.000000e+00 : f32
    %306 = vector.broadcast %cst_93 : f32 to vector<1x128xf32>
    %307 = arith.maximumf %306, %305 : vector<1x128xf32>
    %308 = vector.broadcast %cst_94 : f32 to vector<1x128xf32>
    %309 = arith.minimumf %308, %307 : vector<1x128xf32>
    %cst_95 = arith.constant 4.000000e+00 : f32
    %310 = vector.broadcast %cst_95 : f32 to vector<1x128xf32>
    %311 = arith.cmpf one, %309, %310 : vector<1x128xf32>
    %312 = arith.extui %311 : vector<1x128xi1> to vector<1x128xi32>
    %313 = arith.sitofp %312 : vector<1x128xi32> to vector<1x128xf32>
    %314 = vector.broadcast %313 : vector<1x128xf32> to vector<16x128xf32>
    %315 = arith.mulf %303, %314 : vector<16x128xf32>
    %316 = arith.addf %296, %315 : vector<16x128xf32>
    %cst_96 = arith.constant 0.000000e+00 : f32
    %317 = vector.broadcast %cst_96 : f32 to vector<16x128xf32>
    %318 = arith.cmpf ogt, %315, %317 : vector<16x128xf32>
    %319 = arith.extui %318 : vector<16x128xi1> to vector<16x128xi32>
    %320 = arith.sitofp %319 : vector<16x128xi32> to vector<16x128xf32>
    %321 = arith.addf %301, %320 : vector<16x128xf32>
    %c0_97 = arith.constant 0 : index
    %c0_98 = arith.constant 0 : index
    %322 = vector.load %arg1[%c0_97, %c0_98] : memref<16x128xf32, #tpu.memory_space<vmem>>, vector<16x128xf32>
    %323 = math.roundeven %322 : vector<16x128xf32>
    %cst_99 = arith.constant 0.000000e+00 : f32
    %cst_100 = arith.constant 4.000000e+00 : f32
    %324 = vector.broadcast %cst_99 : f32 to vector<16x128xf32>
    %325 = arith.maximumf %324, %323 : vector<16x128xf32>
    %326 = vector.broadcast %cst_100 : f32 to vector<16x128xf32>
    %327 = arith.minimumf %326, %325 : vector<16x128xf32>
    %cst_101 = arith.constant 4.000000e+00 : f32
    %328 = vector.broadcast %cst_101 : f32 to vector<16x128xf32>
    %329 = arith.cmpf one, %327, %328 : vector<16x128xf32>
    %330 = arith.extui %329 : vector<16x128xi1> to vector<16x128xi32>
    %331 = arith.sitofp %330 : vector<16x128xi32> to vector<16x128xf32>
    %cst_102 = arith.constant 4.000000e+00 : f32
    %332 = vector.broadcast %cst_102 : f32 to vector<16x128xf32>
    %333 = arith.subf %332, %327 : vector<16x128xf32>
    %334 = tpu.iota {dimensions = array<i32: 1>} : vector<1x128xi32>
    %c0_i32 = arith.constant 0 : i32
    %335 = arith.addi %0, %c0_i32 : i32
    %336 = vector.broadcast %335 : i32 to vector<1x128xi32>
    %337 = arith.addi %336, %334 : vector<1x128xi32>
    %c2_i32 = arith.constant 2 : i32
    %338 = vector.broadcast %c2_i32 : i32 to vector<1x128xi32>
    %339 = arith.cmpi slt, %337, %338 : vector<1x128xi32>
    %340 = arith.extui %339 : vector<1x128xi1> to vector<1x128xi32>
    %341 = arith.sitofp %340 : vector<1x128xi32> to vector<1x128xf32>
    %342 = arith.mulf %331, %316 : vector<16x128xf32>
    %343 = vector.broadcast %341 : vector<1x128xf32> to vector<16x128xf32>
    %344 = arith.mulf %342, %343 : vector<16x128xf32>
    %c0_103 = arith.constant 0 : index
    %c0_104 = arith.constant 0 : index
    %345 = vector.load %arg3[%c0_103, %c0_104] : memref<16x128xf32, #tpu.memory_space<vmem>>, vector<16x128xf32>
    tpu.vector_store %arg3[%c0_103, %c0_104], %344 {strides = array<i32>} : memref<16x128xf32, #tpu.memory_space<vmem>>, vector<16x128xf32>,
    %cst_105 = arith.constant dense<0.000000e+00> : vector<128xf32>
    %346 = vector.multi_reduction <add>, %331, %cst_105 [0] : vector<16x128xf32> to vector<128xf32>
    %347 = vector.shape_cast %346 : vector<128xf32> to vector<1x128xf32>
    %348 = arith.mulf %331, %321 : vector<16x128xf32>
    %cst_106 = arith.constant dense<0.000000e+00> : vector<128xf32>
    %349 = vector.multi_reduction <add>, %348, %cst_106 [0] : vector<16x128xf32> to vector<128xf32>
    %350 = vector.shape_cast %349 : vector<128xf32> to vector<1x128xf32>
    %cst_107 = arith.constant 5.000000e-01 : f32
    %351 = vector.broadcast %cst_107 : f32 to vector<1x128xf32>
    %352 = arith.mulf %351, %350 : vector<1x128xf32>
    %353 = arith.cmpf ogt, %342, %333 : vector<16x128xf32>
    %354 = arith.extui %353 : vector<16x128xi1> to vector<16x128xi32>
    %355 = arith.sitofp %354 : vector<16x128xi32> to vector<16x128xf32>
    %356 = arith.mulf %331, %355 : vector<16x128xf32>
    %cst_108 = arith.constant dense<0.000000e+00> : vector<128xf32>
    %357 = vector.multi_reduction <add>, %356, %cst_108 [0] : vector<16x128xf32> to vector<128xf32>
    %358 = vector.shape_cast %357 : vector<128xf32> to vector<1x128xf32>
    %cst_109 = arith.constant 0.000000e+00 : f32
    %359 = vector.broadcast %cst_109 : f32 to vector<1x128xf32>
    %360 = arith.cmpf oeq, %358, %359 : vector<1x128xf32>
    %cst_110 = arith.constant 0.000000e+00 : f32
    %361 = vector.broadcast %cst_110 : f32 to vector<1x128xf32>
    %362 = arith.cmpf ogt, %347, %361 : vector<1x128xf32>
    %363 = arith.andi %360, %362 : vector<1x128xi1>
    %364 = arith.extui %363 : vector<1x128xi1> to vector<1x128xi32>
    %365 = arith.sitofp %364 : vector<1x128xi32> to vector<1x128xf32>
    %cst_111 = arith.constant 1.000000e+00 : f32
    %366 = vector.broadcast %cst_111 : f32 to vector<1x128xf32>
    %cst_112 = arith.constant 0.000000e+00 : f32
    %367 = vector.broadcast %cst_112 : f32 to vector<4x128xf32>
    %368 = tpu.concatenate %347, %352, %365, %366, %367 in 0 : vector<1x128xf32>, vector<1x128xf32>, vector<1x128xf32>, vector<1x128xf32>, vector<4x128xf32> -> vector<8x128xf32>
    %369 = vector.broadcast %341 : vector<1x128xf32> to vector<8x128xf32>
    %370 = arith.mulf %368, %369 : vector<8x128xf32>
    %c0_113 = arith.constant 0 : index
    %c0_114 = arith.constant 0 : index
    %371 = vector.load %arg4[%c0_113, %c0_114] : memref<8x128xf32, #tpu.memory_space<vmem>>, vector<8x128xf32>
    tpu.vector_store %arg4[%c0_113, %c0_114], %370 {strides = array<i32>} : memref<8x128xf32, #tpu.memory_space<vmem>>, vector<8x128xf32>,
    return
  }
  func.func @transform_0(%arg0: i32) -> (i32, i32) {
    %c0_i32 = arith.constant 0 : i32
    %c0_i32_0 = arith.constant 0 : i32
    return %c0_i32, %arg0 : i32, i32
  }
  func.func @transform_1(%arg0: i32) -> (i32, i32) {
    %c0_i32 = arith.constant 0 : i32
    %c0_i32_0 = arith.constant 0 : i32
    return %c0_i32, %arg0 : i32, i32
  }
  func.func @transform_2(%arg0: i32) -> (i32, i32) {
    %c0_i32 = arith.constant 0 : i32
    %c0_i32_0 = arith.constant 0 : i32
    return %c0_i32, %arg0 : i32, i32
  }
  func.func @transform_3(%arg0: i32) -> (i32, i32) {
    %c0_i32 = arith.constant 0 : i32
    %c0_i32_0 = arith.constant 0 : i32
    return %c0_i32, %arg0 : i32, i32
  }
}

</mosaic_0001>

<bundles_post_ra>
// kernel: mol_sampling_metric.1
= control target key start
LH: loop header
LB: loop body
LE: loop exit
PB: predicated region body
PF: predicated region fallthrough
CT: control target
= control target key end

     0   :  { %v27_v0 = vlaneseq  ;;  %v714_v32 = vmov 0.0   ;;  %s922_s0 = inlined_call_operand.vmem [shape: f32[16,128], index: 0, kind: input, shape index: {}]   ;;  %s923_s1 = inlined_call_operand.vmem [shape: s8[256,128], index: 1, kind: input, shape index: {}]   ;;  %s924_s2 = inlined_call_operand.vmem [shape: f32[16,128], index: 2, kind: output, shape index: {0}]   ;;  %s925_s3 = inlined_call_operand.vmem [shape: f32[8,128], index: 3, kind: output, shape index: {1}]  }
   0x1   :  { %v617_v1 = vld [vmem:[%s923_s1] sm:$0xff]   ;;  %v681_v8 = vld [vmem:[%s923_s1 + $0x8] sm:$0xff]   ;;  %v759_v31 = vld [vmem:[%s923_s1 + $0x10] sm:$0xff]  }
   0x2   :  { %v20_v2 = vld [vmem:[%s922_s0] sm:$0x1]  ;;  %v49_v3 = vld [vmem:[%s922_s0 + $0x1] sm:$0x1]  ;;  %v618_v4 = vunpack.c.0.s8 %v617_v1  ;;  %v619_v5 = vunpack.c.1.s8 %v617_v1  ;;  %v28_v7 = vshrl.u32 %v27_v0, 7  ;;  %v622_v9 = vunpack.c.2.s8 %v617_v1 }
   0x3   :  { %v695_v6 = vround.rtne.f32 %v20_v2  ;;  %v696_v10 = vround.rtne.f32 %v49_v3  ;;  %v78_v11 = vld [vmem:[%s922_s0 + $0x2] sm:$0x1]  ;;  %v623_v13 = vunpack.c.3.s8 %v617_v1  ;;  %v626_v14 = vunpack.c.0.s8 %v681_v8  ;;  %v107_v15 = vld [vmem:[%s922_s0 + $0x3] sm:$0x1]  ;;  %v136_v36 = vld [vmem:[%s922_s0 + $0x4] sm:$0x1] }
   0x4   :  { %v18_v16 = vcvt.s32.f32 %v618_v4  ;;  %v19_v17 = vcvt.s32.f32 %v619_v5  ;;  %v627_v19 = vunpack.c.1.s8 %v681_v8  ;;  %v754_v21 = vsub.s32 0, %v28_v7 }
   0x5   :  { %v22_v12 = vmax.f32 %v695_v6, 0.0  ;;  %v51_v18 = vmax.f32 %v696_v10, 0.0  ;;  %v697_v22 = vround.rtne.f32 %v78_v11  ;;  %v630_v23 = vunpack.c.2.s8 %v681_v8  ;;  %v165_v11 = vld [vmem:[%s922_s0 + $0x5] sm:$0x1] }
   0x6   :  { %v47_v24 = vcvt.s32.f32 %v622_v9  ;;  %v631_v26 = vunpack.c.3.s8 %v681_v8  ;;  %v698_v27 = vround.rtne.f32 %v107_v15  ;;  %v48_v28 = vcvt.s32.f32 %v623_v13  ;;  %v194_v13 = vld [vmem:[%s922_s0 + $0x6] sm:$0x1] }
   0x7   :  { %v23_v20 = vmin.f32 %v22_v12, 4.0  ;;  %v52_v25 = vmin.f32 %v51_v18, 4.0  ;;  %v76_v29 = vcvt.s32.f32 %v626_v14  ;;  %v80_v30 = vmax.f32 %v697_v22, 0.0  ;;  %v685_v18 = vld [vmem:[%s923_s1 + $0x18] sm:$0xff]  }
   0x8   :  { %v77_v34 = vcvt.s32.f32 %v627_v19  ;;  %v109_v35 = vmax.f32 %v698_v27, 0.0  ;;  %v105_v40 = vcvt.s32.f32 %v630_v23  ;;  %v106_v42 = vcvt.s32.f32 %v631_v26 }
   0x9   :  { %vm24_vm0 = vcmp.ne.f32.partialorder %v23_v20, 4.0  ;;  %vm53_vm1 = vcmp.ne.f32.partialorder %v52_v25, 4.0  ;;  %v81_v39 = vmin.f32 %v80_v30, 4.0  ;;  %v634_v44 = vunpack.c.0.s8 %v759_v31 }
   0xa   :  { %v562_v33 = vsel %vm24_vm0, 1.0, %v714_v32  ;;  %v565_v38 = vsel %vm53_vm1, 1.0, %v714_v32  ;;  %v110_v43 = vmin.f32 %v109_v35, 4.0  ;;  %v699_v47 = vround.rtne.f32 %v136_v36 }
   0xb   :  { %v30_v37 = vrot.slane %v562_v33, %v754_v21  ;;  %v59_v41 = vrot.slane %v565_v38, %v754_v21  ;;  %vm82_vm2 = vcmp.ne.f32.partialorder %v81_v39, 4.0  ;;  %v635_v2 = vunpack.c.1.s8 %v759_v31 }
   0xc   :  { %v568_v50 = vsel %vm82_vm2, 1.0, %v714_v32  ;;  %vm111_vm3 = vcmp.ne.f32.partialorder %v110_v43, 4.0  ;;  %v138_v62 = vmax.f32 %v699_v47, 0.0  ;;  %v134_v10 = vcvt.s32.f32 %v634_v44  ;;  %v252_v44 = vld [vmem:[%s922_s0 + $0x8] sm:$0x1] }
   0xd   :  { %v31_v45 = vmul.f32 %v30_v37, %v18_v16  ;;  %v32_v46 = vmul.f32 %v30_v37, %v19_v17  ;;  %v60_v48 = vmul.f32 %v59_v41, %v47_v24  ;;  %v61_v49 = vmul.f32 %v59_v41, %v48_v28 }
   0xe   :  { %v88_v51 = vrot.slane %v568_v50, %v754_v21  ;;  %v571_v52 = vsel %vm111_vm3, 1.0, %v714_v32  ;;  %v139_v8 = vmin.f32 %v138_v62, 4.0  ;;  %v135_v12 = vcvt.s32.f32 %v635_v2 }
   0xf   :  { %vm35_vm4 = vcmp.gt.f32.partialorder %v31_v45, 0.0  ;;  %vm36_vm5 = vcmp.gt.f32.partialorder %v32_v46, 0.0  ;;  %v62_v55 = vadd.f32 %v60_v48, %v31_v45  ;;  %v63_v56 = vadd.f32 %v61_v49, %v32_v46 }
  0x10   :  { %v563_v53 = vsel %vm35_vm4, 1.0, %v714_v32  ;;  %v564_v54 = vsel %vm36_vm5, 1.0, %v714_v32  ;;  %vm64_vm6 = vcmp.gt.f32.partialorder %v60_v48, 0.0  ;;  %vm65_vm7 = vcmp.gt.f32.partialorder %v61_v49, 0.0  ;;  %v805_v49 = vld [vmem:[%s923_s1 + $0x20] sm:$0xff]  }
  0x11   :  { %v89_v57 = vmul.f32 %v88_v51, %v76_v29  ;;  %v90_v58 = vmul.f32 %v88_v51, %v77_v34  ;;  %v566_v59 = vsel %vm64_vm6, 1.0, %v714_v32  ;;  %v567_v60 = vsel %vm65_vm7, 1.0, %v714_v32 }
  0x12   :  { %v117_v61 = vrot.slane %v571_v52, %v754_v21  ;;  %v70_v63 = vadd.f32 %v566_v59, %v563_v53  ;;  %v71_v1 = vadd.f32 %v567_v60, %v564_v54  ;;  %vm140_vm12 = vcmp.ne.f32.partialorder %v139_v8, 4.0 }
  0x13   :  { %v91_v3 = vadd.f32 %v89_v57, %v62_v55  ;;  %vm93_vm8 = vcmp.gt.f32.partialorder %v89_v57, 0.0  ;;  %vm94_vm9 = vcmp.gt.f32.partialorder %v90_v58, 0.0  ;;  %v92_v9 = vadd.f32 %v90_v58, %v63_v56 }
  0x14   :  { %v118_v4 = vmul.f32 %v117_v61, %v105_v40  ;;  %v569_v5 = vsel %vm93_vm8, 1.0, %v714_v32  ;;  %v570_v6 = vsel %vm94_vm9, 1.0, %v714_v32  ;;  %v119_v7 = vmul.f32 %v117_v61, %v106_v42 }
  0x15   :  { %v99_v14 = vadd.f32 %v569_v5, %v70_v63  ;;  %v100_v15 = vadd.f32 %v570_v6, %v71_v1  ;;  %v574_v16 = vsel %vm140_vm12, 1.0, %v714_v32  ;;  %v638_v17 = vunpack.c.2.s8 %v759_v31 }
  0x16   :  { %vm122_vm10 = vcmp.gt.f32.partialorder %v118_v4, 0.0  ;;  %vm123_vm11 = vcmp.gt.f32.partialorder %v119_v7, 0.0  ;;  %v120_v19 = vadd.f32 %v118_v4, %v91_v3  ;;  %v146_v22 = vrot.slane %v574_v16, %v754_v21 }
  0x17   :  { %v572_v20 = vsel %vm122_vm10, 1.0, %v714_v32  ;;  %v639_v23 = vunpack.c.3.s8 %v759_v31  ;;  %v121_v24 = vadd.f32 %v119_v7, %v92_v9  ;;  %v573_v25 = vsel %vm123_vm11, 1.0, %v714_v32  ;;  %v223_v31 = vld [vmem:[%s922_s0 + $0x7] sm:$0x1] }
  0x18   :  { %v700_v26 = vround.rtne.f32 %v165_v11  ;;  %v701_v27 = vround.rtne.f32 %v194_v13  ;;  %v147_v28 = vmul.f32 %v146_v22, %v134_v10  ;;  %v148_v29 = vmul.f32 %v146_v22, %v135_v12 }
  0x19   :  { %v642_v30 = vunpack.c.0.s8 %v685_v18  ;;  %v643_v33 = vunpack.c.1.s8 %v685_v18  ;;  %v128_v34 = vadd.f32 %v572_v20, %v99_v14  ;;  %v163_v35 = vcvt.s32.f32 %v638_v17  ;;  %v281_v17 = vld [vmem:[%s922_s0 + $0x9] sm:$0x1]  ;;  %v310_v20 = vld [vmem:[%s922_s0 + $0xa] sm:$0x1] }
  0x1a   :  { %v167_v36 = vmax.f32 %v700_v26, 0.0  ;;  %v196_v37 = vmax.f32 %v701_v27, 0.0  ;;  %v129_v38 = vadd.f32 %v573_v25, %v100_v15  ;;  %vm151_vm13 = vcmp.gt.f32.partialorder %v147_v28, 0.0  ;;  %v689_v26 = vld [vmem:[%s923_s1 + $0x28] sm:$0xff]  }
  0x1b   :  { %vm152_vm14 = vcmp.gt.f32.partialorder %v148_v29, 0.0  ;;  %v164_v39 = vcvt.s32.f32 %v639_v23  ;;  %v646_v42 = vunpack.c.2.s8 %v685_v18  ;;  %v647_v43 = vunpack.c.3.s8 %v685_v18 }
  0x1c   :  { %v168_v40 = vmin.f32 %v167_v36, 4.0  ;;  %v197_v41 = vmin.f32 %v196_v37, 4.0  ;;  %v149_v45 = vadd.f32 %v147_v28, %v120_v19  ;;  %v575_v46 = vsel %vm151_vm13, 1.0, %v714_v32 }
  0x1d   :  { %v192_v47 = vcvt.s32.f32 %v642_v30  ;;  %v193_v48 = vcvt.s32.f32 %v643_v33  ;;  %v576_v50 = vsel %vm152_vm14, 1.0, %v714_v32  ;;  %v702_v51 = vround.rtne.f32 %v223_v31 }
  0x1e   :  { %vm169_vm15 = vcmp.ne.f32.partialorder %v168_v40, 4.0  ;;  %vm198_vm0 = vcmp.ne.f32.partialorder %v197_v41, 4.0  ;;  %v150_v52 = vadd.f32 %v148_v29, %v121_v24  ;;  %v703_v55 = vround.rtne.f32 %v252_v44 }
  0x1f   :  { %v577_v53 = vsel %vm169_vm15, 1.0, %v714_v32  ;;  %v580_v54 = vsel %vm198_vm0, 1.0, %v714_v32  ;;  %v225_v58 = vmax.f32 %v702_v51, 0.0  ;;  %v650_v59 = vunpack.c.0.s8 %v805_v49 }
  0x20   :  { %v175_v56 = vrot.slane %v577_v53, %v754_v21  ;;  %v204_v57 = vrot.slane %v580_v54, %v754_v21  ;;  %v157_v60 = vadd.f32 %v575_v46, %v128_v34  ;;  %v158_v61 = vadd.f32 %v576_v50, %v129_v38 }
  0x21   :  { %v221_v62 = vcvt.s32.f32 %v646_v42  ;;  %v254_v63 = vmax.f32 %v703_v55, 0.0  ;;  %v222_v3 = vcvt.s32.f32 %v647_v43  ;;  %v651_v4 = vunpack.c.1.s8 %v805_v49 }
  0x22   :  { %v176_v1 = vmul.f32 %v175_v56, %v163_v35  ;;  %v177_v2 = vmul.f32 %v175_v56, %v164_v39  ;;  %v205_v5 = vmul.f32 %v204_v57, %v192_v47  ;;  %v206_v6 = vmul.f32 %v204_v57, %v193_v48  ;;  %v841_v57 = vld [vmem:[%s923_s1 + $0x30] sm:$0xff]  }
  0x23   :  { %v226_v7 = vmin.f32 %v225_v58, 4.0  ;;  %v255_v8 = vmin.f32 %v254_v63, 4.0  ;;  %v250_v10 = vcvt.s32.f32 %v650_v59  ;;  %v251_v15 = vcvt.s32.f32 %v651_v4  ;;  %v368_v58 = vld [vmem:[%s922_s0 + $0xc] sm:$0x1] }
  0x24   :  { %v178_v9 = vadd.f32 %v176_v1, %v149_v45  ;;  %vm180_vm1 = vcmp.gt.f32.partialorder %v176_v1, 0.0  ;;  %vm181_vm2 = vcmp.gt.f32.partialorder %v177_v2, 0.0  ;;  %vm209_vm3 = vcmp.gt.f32.partialorder %v205_v5, 0.0 }
  0x25   :  { %v578_v11 = vsel %vm180_vm1, 1.0, %v714_v32  ;;  %v579_v12 = vsel %vm181_vm2, 1.0, %v714_v32  ;;  %vm210_vm4 = vcmp.gt.f32.partialorder %v206_v6, 0.0  ;;  %v179_v13 = vadd.f32 %v177_v2, %v150_v52  ;;  %v339_v52 = vld [vmem:[%s922_s0 + $0xb] sm:$0x1] }
  0x26   :  { %v186_v14 = vadd.f32 %v578_v11, %v157_v60  ;;  %v654_v16 = vunpack.c.2.s8 %v805_v49  ;;  %v187_v18 = vadd.f32 %v579_v12, %v158_v61  ;;  %v581_v19 = vsel %vm209_vm3, 1.0, %v714_v32 }
  0x27   :  { %vm227_vm5 = vcmp.ne.f32.partialorder %v226_v7, 4.0  ;;  %vm256_vm6 = vcmp.ne.f32.partialorder %v255_v8, 4.0  ;;  %v582_v22 = vsel %vm210_vm4, 1.0, %v714_v32  ;;  %v655_v25 = vunpack.c.3.s8 %v805_v49 }
  0x28   :  { %v583_v23 = vsel %vm227_vm5, 1.0, %v714_v32  ;;  %v586_v24 = vsel %vm256_vm6, 1.0, %v714_v32  ;;  %v207_v27 = vadd.f32 %v205_v5, %v178_v9  ;;  %v704_v30 = vround.rtne.f32 %v281_v17 }
  0x29   :  { %v233_v28 = vrot.slane %v583_v23, %v754_v21  ;;  %v262_v29 = vrot.slane %v586_v24, %v754_v21  ;;  %v208_v33 = vadd.f32 %v206_v6, %v179_v13  ;;  %v215_v34 = vadd.f32 %v581_v19, %v186_v14 }
  0x2a   :  { %v279_v35 = vcvt.s32.f32 %v654_v16  ;;  %v705_v36 = vround.rtne.f32 %v310_v20  ;;  %v216_v37 = vadd.f32 %v582_v22, %v187_v18  ;;  %v658_v31 = vunpack.c.0.s8 %v689_v26 }
  0x2b   :  { %v234_v38 = vmul.f32 %v233_v28, %v221_v62  ;;  %v235_v39 = vmul.f32 %v233_v28, %v222_v3  ;;  %v263_v40 = vmul.f32 %v262_v29, %v250_v10  ;;  %v283_v41 = vmax.f32 %v704_v30, 0.0 }
  0x2c   :  { %v659_v42 = vunpack.c.1.s8 %v689_v26  ;;  %v312_v43 = vmax.f32 %v705_v36, 0.0  ;;  %v264_v45 = vmul.f32 %v262_v29, %v251_v15  ;;  %v280_v48 = vcvt.s32.f32 %v655_v25  ;;  %v426_v36 = vld [vmem:[%s922_s0 + $0xe] sm:$0x1] }
  0x2d   :  { %v236_v44 = vadd.f32 %v234_v38, %v207_v27  ;;  %vm238_vm7 = vcmp.gt.f32.partialorder %v234_v38, 0.0  ;;  %vm239_vm8 = vcmp.gt.f32.partialorder %v235_v39, 0.0  ;;  %vm267_vm9 = vcmp.gt.f32.partialorder %v263_v40, 0.0 }
  0x2e   :  { %v584_v46 = vsel %vm238_vm7, 1.0, %v714_v32  ;;  %v585_v47 = vsel %vm239_vm8, 1.0, %v714_v32  ;;  %vm268_vm10 = vcmp.gt.f32.partialorder %v264_v45, 0.0  ;;  %v308_v49 = vcvt.s32.f32 %v658_v31 }
  0x2f   :  { %v662_v50 = vunpack.c.2.s8 %v689_v26  ;;  %v663_v51 = vunpack.c.3.s8 %v689_v26  ;;  %v237_v53 = vadd.f32 %v235_v39, %v208_v33  ;;  %v284_v54 = vmin.f32 %v283_v41, 4.0 }
  0x30   :  { %v309_v55 = vcvt.s32.f32 %v659_v42  ;;  %v313_v56 = vmin.f32 %v312_v43, 4.0  ;;  %v244_v59 = vadd.f32 %v584_v46, %v215_v34  ;;  %v245_v60 = vadd.f32 %v585_v47, %v216_v37  ;;  %v397_v34 = vld [vmem:[%s922_s0 + $0xd] sm:$0x1] }
  0x31   :  { %v265_v61 = vadd.f32 %v263_v40, %v236_v44  ;;  %v587_v62 = vsel %vm267_vm9, 1.0, %v714_v32  ;;  %v588_v63 = vsel %vm268_vm10, 1.0, %v714_v32  ;;  %vm285_vm11 = vcmp.ne.f32.partialorder %v284_v54, 4.0  ;;  %v871_v40 = vld [vmem:[%s923_s1 + $0x38] sm:$0xff]  }
  0x32   :  { %vm314_vm12 = vcmp.ne.f32.partialorder %v313_v56, 4.0  ;;  %v706_v1 = vround.rtne.f32 %v339_v52  ;;  %v589_v2 = vsel %vm285_vm11, 1.0, %v714_v32  ;;  %v666_v4 = vunpack.c.0.s8 %v841_v57 }
  0x33   :  { %v592_v3 = vsel %vm314_vm12, 1.0, %v714_v32  ;;  %v707_v5 = vround.rtne.f32 %v368_v58  ;;  %v266_v6 = vadd.f32 %v264_v45, %v237_v53  ;;  %v291_v7 = vrot.slane %v589_v2, %v754_v21  ;;  %v455_v2 = vld [vmem:[%s922_s0 + $0xf] sm:$0x1] }
  0x34   :  { %v320_v8 = vrot.slane %v592_v3, %v754_v21  ;;  %v341_v9 = vmax.f32 %v706_v1, 0.0  ;;  %v273_v10 = vadd.f32 %v587_v62, %v244_v59  ;;  %v274_v11 = vadd.f32 %v588_v63, %v245_v60  ;;  %v478_v3 = vld [vmem:[%s922_s0] sm:$0xff] }
  0x35   :  { %v337_v12 = vcvt.s32.f32 %v662_v50  ;;  %v370_v13 = vmax.f32 %v707_v5, 0.0  ;;  %v292_v14 = vmul.f32 %v291_v7, %v279_v35  ;;  %v293_v15 = vmul.f32 %v291_v7, %v280_v48 }
  0x36   :  { %v338_v16 = vcvt.s32.f32 %v663_v51  ;;  %v667_v17 = vunpack.c.1.s8 %v841_v57  ;;  %v321_v18 = vmul.f32 %v320_v8, %v308_v49  ;;  %v342_v19 = vmin.f32 %v341_v9, 4.0 }
  0x37   :  { %v366_v20 = vcvt.s32.f32 %v666_v4  ;;  %v371_v22 = vmin.f32 %v370_v13, 4.0  ;;  %vm296_vm13 = vcmp.gt.f32.partialorder %v292_v14, 0.0  ;;  %vm297_vm14 = vcmp.gt.f32.partialorder %v293_v15, 0.0 }
  0x38   :  { %v322_v23 = vmul.f32 %v320_v8, %v309_v55  ;;  %v670_v24 = vunpack.c.2.s8 %v841_v57  ;;  %v294_v25 = vadd.f32 %v292_v14, %v265_v61  ;;  %v590_v26 = vsel %vm296_vm13, 1.0, %v714_v32  ;;  %v479_v8 = vld [vmem:[%s922_s0 + $0x8] sm:$0xff] }
  0x39   :  { %v591_v27 = vsel %vm297_vm14, 1.0, %v714_v32  ;;  %vm325_vm15 = vcmp.gt.f32.partialorder %v321_v18, 0.0  ;;  %v295_v28 = vadd.f32 %v293_v15, %v266_v6  ;;  %v302_v29 = vadd.f32 %v590_v26, %v273_v10 }
  0x3a   :  { %v367_v30 = vcvt.s32.f32 %v667_v17  ;;  %v671_v33 = vunpack.c.3.s8 %v841_v57  ;;  %vm326_vm0 = vcmp.gt.f32.partialorder %v322_v23, 0.0  ;;  %v593_v35 = vsel %vm325_vm15, 1.0, %v714_v32 }
  0x3b   :  { %vm343_vm1 = vcmp.ne.f32.partialorder %v342_v19, 4.0  ;;  %vm372_vm2 = vcmp.ne.f32.partialorder %v371_v22, 4.0  ;;  %v303_v37 = vadd.f32 %v591_v27, %v274_v11  ;;  %v395_v31 = vcvt.s32.f32 %v670_v24 }
  0x3c   :  { %v595_v38 = vsel %vm343_vm1, 1.0, %v714_v32  ;;  %v598_v39 = vsel %vm372_vm2, 1.0, %v714_v32  ;;  %v323_v41 = vadd.f32 %v321_v18, %v294_v25  ;;  %v708_v44 = vround.rtne.f32 %v397_v34 }
  0x3d   :  { %v349_v42 = vrot.slane %v595_v38, %v754_v21  ;;  %v378_v43 = vrot.slane %v598_v39, %v754_v21  ;;  %v324_v45 = vadd.f32 %v322_v23, %v295_v28  ;;  %v594_v46 = vsel %vm326_vm0, 1.0, %v714_v32 }
  0x3e   :  { %v331_v47 = vadd.f32 %v593_v35, %v302_v29  ;;  %v709_v48 = vround.rtne.f32 %v426_v36  ;;  %v674_v51 = vunpack.c.0.s8 %v871_v40  ;;  %v675_v52 = vunpack.c.1.s8 %v871_v40 }
  0x3f   :  { %v350_v49 = vmul.f32 %v349_v42, %v337_v12  ;;  %v351_v50 = vmul.f32 %v349_v42, %v338_v16  ;;  %v379_v53 = vmul.f32 %v378_v43, %v366_v20  ;;  %v380_v54 = vmul.f32 %v378_v43, %v367_v30 }
  0x40   :  { %v399_v55 = vmax.f32 %v708_v44, 0.0  ;;  %v428_v56 = vmax.f32 %v709_v48, 0.0  ;;  %v332_v57 = vadd.f32 %v594_v46, %v303_v37  ;;  %v396_v62 = vcvt.s32.f32 %v671_v33 }
  0x41   :  { %v352_v58 = vadd.f32 %v350_v49, %v323_v41  ;;  %vm354_vm3 = vcmp.gt.f32.partialorder %v350_v49, 0.0  ;;  %vm355_vm4 = vcmp.gt.f32.partialorder %v351_v50, 0.0  ;;  %vm383_vm5 = vcmp.gt.f32.partialorder %v379_v53, 0.0 }
  0x42   :  { %v596_v59 = vsel %vm354_vm3, 1.0, %v714_v32  ;;  %v597_v60 = vsel %vm355_vm4, 1.0, %v714_v32  ;;  %vm384_vm6 = vcmp.gt.f32.partialorder %v380_v54, 0.0  ;;  %v353_v61 = vadd.f32 %v351_v50, %v324_v45 }
  0x43   :  { %v424_v63 = vcvt.s32.f32 %v674_v51  ;;  %v678_v1 = vunpack.c.2.s8 %v871_v40  ;;  %v360_v4 = vadd.f32 %v596_v59, %v331_v47  ;;  %v400_v5 = vmin.f32 %v399_v55, 4.0 }
  0x44   :  { %v425_v6 = vcvt.s32.f32 %v675_v52  ;;  %v429_v7 = vmin.f32 %v428_v56, 4.0  ;;  %v361_v9 = vadd.f32 %v597_v60, %v332_v57  ;;  %v381_v10 = vadd.f32 %v379_v53, %v352_v58 }
  0x45   :  { %v599_v11 = vsel %vm383_vm5, 1.0, %v714_v32  ;;  %v600_v12 = vsel %vm384_vm6, 1.0, %v714_v32  ;;  %vm401_vm7 = vcmp.ne.f32.partialorder %v400_v5, 4.0  ;;  %v710_v13 = vround.rtne.f32 %v455_v2 }
  0x46   :  { %vm430_vm8 = vcmp.ne.f32.partialorder %v429_v7, 4.0  ;;  %v711_v14 = vround.rtne.f32 %v478_v3  ;;  %v382_v15 = vadd.f32 %v380_v54, %v353_v61  ;;  %v601_v16 = vsel %vm401_vm7, 1.0, %v714_v32 }
  0x47   :  { %v604_v17 = vsel %vm430_vm8, 1.0, %v714_v32  ;;  %v712_v18 = vround.rtne.f32 %v479_v8  ;;  %v407_v19 = vrot.slane %v601_v16, %v754_v21  ;;  %v457_v22 = vmax.f32 %v710_v13, 0.0 }
  0x48   :  { %v436_v20 = vrot.slane %v604_v17, %v754_v21  ;;  %v482_v23 = vmax.f32 %v711_v14, 0.0  ;;  %v389_v24 = vadd.f32 %v599_v11, %v360_v4  ;;  %v390_v25 = vadd.f32 %v600_v12, %v361_v9 }
  0x49   :  { %v679_v26 = vunpack.c.3.s8 %v871_v40  ;;  %v483_v27 = vmax.f32 %v712_v18, 0.0  ;;  %v408_v28 = vmul.f32 %v407_v19, %v395_v31  ;;  %v409_v29 = vmul.f32 %v407_v19, %v396_v62 }
  0x4a   :  { %v437_v30 = vmul.f32 %v436_v20, %v424_v63  ;;  %v495_v33 = vand.u32 127, %v27_v0  ;;  %v438_v34 = vmul.f32 %v436_v20, %v425_v6  ;;  %v458_v35 = vmin.f32 %v457_v22, 4.0 }
  0x4b   :  { %v484_v36 = vmin.f32 %v482_v23, 4.0  ;;  %v485_v37 = vmin.f32 %v483_v27, 4.0  ;;  %v410_v38 = vadd.f32 %v408_v28, %v381_v10  ;;  %v411_v39 = vadd.f32 %v409_v29, %v382_v15 }
  0x4c   :  { %vm412_vm9 = vcmp.gt.f32.partialorder %v408_v28, 0.0  ;;  %vm413_vm10 = vcmp.gt.f32.partialorder %v409_v29, 0.0  ;;  %vm441_vm11 = vcmp.gt.f32.partialorder %v437_v30, 0.0  ;;  %vm442_vm12 = vcmp.gt.f32.partialorder %v438_v34, 0.0 }
  0x4d   :  { %v602_v41 = vsel %vm412_vm9, 1.0, %v714_v32  ;;  %v603_v42 = vsel %vm413_vm10, 1.0, %v714_v32  ;;  %v453_v31 = vcvt.s32.f32 %v678_v1  ;;  %v454_v43 = vcvt.s32.f32 %v679_v26 }
  0x4e   :  { %v418_v40 = vadd.f32 %v602_v41, %v389_v24  ;;  %vm498_vm13 = vcmp.lt.s32.totalorder %v495_v33, 2  ;;  %v419_v44 = vadd.f32 %v603_v42, %v390_v25  ;;  %v439_v0 = vadd.f32 %v437_v30, %v410_v38 }
  0x4f   :  { %vm459_vm14 = vcmp.ne.f32.partialorder %v458_v35, 4.0  ;;  %vm486_vm15 = vcmp.ne.f32.partialorder %v484_v36, 4.0  ;;  %v605_v45 = vsel %vm441_vm11, 1.0, %v714_v32  ;;  %v606_v46 = vsel %vm442_vm12, 1.0, %v714_v32 }
  0x50   :  { %v607_v47 = vsel %vm459_vm14, 1.0, %v714_v32  ;;  %vm487_vm0 = vcmp.ne.f32.partialorder %v485_v37, 4.0  ;;  %v440_v48 = vadd.f32 %v438_v34, %v411_v39  ;;  %v610_v50 = vsel %vm486_vm15, 1.0, %v714_v32 }
  0x51   :  { %v465_v49 = vrot.slane %v607_v47, %v754_v21  ;;  %v611_v51 = vsel %vm487_vm0, 1.0, %v714_v32  ;;  %v447_v53 = vadd.f32 %v605_v45, %v418_v40  ;;  %v448_v54 = vadd.f32 %v606_v46, %v419_v44 }
  0x52   :  { %v507_v52 = vadd.f32 %v611_v51, %v610_v50  ;;  %v492_v57 = vsub.f32 4.0, %v484_v36  ;;  %v612_v58 = vsel %vm498_vm13, 1.0, %v714_v32  ;;  %v493_v63 = vsub.f32 4.0, %v485_v37 }
  0x53   :  { %v466_v55 = vmul.f32 %v465_v49, %v453_v31  ;;  %v467_v56 = vmul.f32 %v465_v49, %v454_v43  ;;  %vm544_vm5 = vcmask 1040384   ;;  %vm546_vm8 = vcmask 1041408  }
  0x54   :  { %v508_v59 = vrot.slane %v507_v52, 4  ;;  %vm548_vm10 = vcmask 1042432   ;;  %vm550_vm11 = vcmask 1043456  }
  0x55   :  { %v468_v60 = vadd.f32 %v466_v55, %v439_v0  ;;  %v469_v61 = vadd.f32 %v467_v56, %v440_v48  ;;  %vm470_vm1 = vcmp.gt.f32.partialorder %v466_v55, 0.0  ;;  %vm471_vm2 = vcmp.gt.f32.partialorder %v467_v56, 0.0 }
  0x56   :  { %v608_v21 = vsel %vm470_vm1, 1.0, %v714_v32  ;;  %v609_v62 = vsel %vm471_vm2, 1.0, %v714_v32  ;;  %v509_v1 = vadd.f32 %v508_v59, %v507_v52 }
  0x57   :  { %v476_v2 = vadd.f32 %v608_v21, %v447_v53  ;;  %v477_v3 = vadd.f32 %v609_v62, %v448_v54  ;;  %v501_v4 = vmul.f32 %v610_v50, %v468_v60  ;;  %v502_v5 = vmul.f32 %v611_v51, %v469_v61 }
  0x58   :  { %v510_v10 = vrot.slane %v509_v1, 2 }
  0x59   :  { %v503_v6 = vmul.f32 %v612_v58, %v501_v4  ;;  %v504_v7 = vmul.f32 %v612_v58, %v502_v5  ;;  %v514_v8 = vmul.f32 %v610_v50, %v476_v2  ;;  %v515_v9 = vmul.f32 %v611_v51, %v477_v3 }
  0x5a   :  { %vm524_vm3 = vcmp.gt.f32.partialorder %v501_v4, %v492_v57  ;;  %vm525_vm4 = vcmp.gt.f32.partialorder %v502_v5, %v493_v63  ;;  %v511_v17 = vadd.f32 %v510_v10, %v509_v1 }
  0x5b   :  { %505 = vst [vmem:[%s924_s2] sm:$0xff] %v503_v6  ;;  %506 = vst [vmem:[%s924_s2 + $0x8] sm:$0xff] %v504_v7  ;;  %v516_v11 = vadd.f32 %v515_v9, %v514_v8  ;;  %v613_v12 = vsel %vm524_vm3, 1.0, %v714_v32  ;;  %v614_v13 = vsel %vm525_vm4, 1.0, %v714_v32 }
  0x5c   :  { %v530_v14 = vmul.f32 %v613_v12, %v610_v50  ;;  %v531_v15 = vmul.f32 %v614_v13, %v611_v51  ;;  %v512_v23 = vrot.slane %v511_v17, 1 }
  0x5d   :  { %v517_v16 = vrot.slane %v516_v11, 4 }
  0x5e   :  { %v532_v18 = vadd.f32 %v531_v15, %v530_v14  ;;  %v513_v28 = vadd.f32 %v512_v23, %v511_v17 }
  0x5f   :  { %v518_v19 = vadd.f32 %v517_v16, %v516_v11 }
  0x60   :  { %v533_v20 = vrot.slane %v532_v18, 4  ;;  %vm540_vm6 = vcmp.gt.f32.partialorder %v513_v28, 0.0 }
  0x61   :  { %v519_v22 = vrot.slane %v518_v19, 2 }
  0x62   :  { %v534_v24 = vadd.f32 %v533_v20, %v532_v18 }
  0x63   :  { %v520_v25 = vadd.f32 %v519_v22, %v518_v19 }
  0x64   :  { %v535_v26 = vrot.slane %v534_v24, 2 }
  0x65   :  { %v521_v27 = vrot.slane %v520_v25, 1 }
  0x66   :  { %v536_v29 = vadd.f32 %v535_v26, %v534_v24 }
  0x67   :  { %v522_v30 = vadd.f32 %v521_v27, %v520_v25 }
  0x68   :  { %v537_v33 = vrot.slane %v536_v29, 1 }
  0x69   :  { %v523_v34 = vmul.f32 0.5, %v522_v30 }
  0x6a   :  { %v538_v35 = vadd.f32 %v537_v33, %v536_v29 }
  0x6b   :  { %v545_v36 = vsel %vm544_vm5, %v513_v28, %v523_v34 }
  0x6c   :  { %vm539_vm7 = vcmp.eq.f32.partialorder %v538_v35, 0.0 }
  0x6d   :  { %vm541_vm9 = vmand %vm539_vm7, %vm540_vm6 }
  0x6e   :  { %v615_v37 = vsel %vm541_vm9, 1.0, %v714_v32 }
  0x6f   :  { %v547_v38 = vsel %vm546_vm8, %v545_v36, %v615_v37 }
  0x70   :  { %v549_v39 = vsel %vm548_vm10, %v547_v38, 1.0 }
  0x71   :  { %v551_v41 = vsel %vm550_vm11, %v549_v39, 0.0 }
  0x72   :  { %v552_v42 = vmul.f32 %v612_v58, %v551_v41 }
  0x74   :  { %553 = vst [vmem:[%s925_s3] sm:$0xff] %v552_v42 }

</bundles_post_ra>
